<compile_context>
chip_gen: v5e
topology: v5e:2x2
jax: 0.10.0
libtpu: 0.0.40
codegen_flags: <defaults>
</compile_context>

<pallas_src>
import jax
import jax.numpy as jnp
from jax.experimental import pallas as pl
from jax.experimental.pallas import tpu as pltpu


# ----------------------------- Pallas kernels ------------------------------

def _text_kernel(embs_ref, mask_ref, w_ref, b_ref, out_ref, sum_acc, den_acc):
    """Text head, S-chunked reduction.

    embs: [tb, ts, Hp] bf16   mask: [tb, ts] f32   w: [Hp, Dp] bf16
    b:    [1, Dp]  f32        out:  [tb, Dp] f32
    scratch: sum_acc [tb, Hp] f32, den_acc [tb, 1] f32
    """
    s = pl.program_id(1)

    @pl.when(s == 0)
    def _():
        sum_acc[...] = jnp.zeros_like(sum_acc)
        den_acc[...] = jnp.zeros_like(den_acc)

    # (embs * mask.unsqueeze(2)).sum(dim=1), accumulated chunk-by-chunk over S.
    # f32 math on the VPU (v5e has no bf16 VALU); the f32 working set is one
    # [tb, ts, Hp] chunk, bounded by the seq chunking.
    embs = embs_ref[...].astype(jnp.float32)                    # [tb, ts, Hp]
    mask = mask_ref[...]                                        # [tb, ts]
    sum_acc[...] += jnp.sum(embs * mask[:, :, None], axis=1)    # [tb, Hp]
    den_acc[...] += jnp.sum(mask, axis=1, keepdims=True)        # [tb, 1]

    @pl.when(s == pl.num_programs(1) - 1)
    def _():
        # masked mean (division matches torch; all-zero mask rows give NaN,
        # same as the reference module).
        pooled = sum_acc[...] / den_acc[...]                    # [tb, Hp] f32
        # LinearProjection / nn.Linear — bf16 operands to the MXU, f32 accum.
        proj = jnp.dot(pooled.astype(jnp.bfloat16), w_ref[...],
                       preferred_element_type=jnp.float32) + b_ref[...]
        # F.normalize(x, dim=-1): x * rsqrt(max(sum(x^2), eps^2))
        sumsq = jnp.sum(proj * proj, axis=-1, keepdims=True)
        out_ref[...] = proj * jax.lax.rsqrt(jnp.maximum(sumsq, 1e-24))


def _image_kernel(pooled_ref, wp_ref, bp_ref, wh_ref, bh_ref, out_ref):
    """Image head: patch-embed matmul -> head matmul -> L2 normalize.

    pooled: [tb, pdp] bf16   wp: [pdp, Hvp] bf16   bp: [1, Hvp] f32
    wh:     [Hvp, Dp] bf16   bh: [1, Dp]    f32    out: [tb, Dp] f32
    """
    x = jnp.dot(pooled_ref[...], wp_ref[...],
                preferred_element_type=jnp.float32) + bp_ref[...]      # [tb, Hvp]
    feat = jnp.dot(x.astype(jnp.bfloat16), wh_ref[...],
                   preferred_element_type=jnp.float32) + bh_ref[...]   # [tb, Dp]
    sumsq = jnp.sum(feat * feat, axis=-1, keepdims=True)
    out_ref[...] = feat * jax.lax.rsqrt(jnp.maximum(sumsq, 1e-24))


# ------------------------------ helpers ------------------------------------

def _round_up(x, m):
    return ((x + m - 1) // m) * m


def _pad_to(x, shape):
    pads = [(0, t - s) for s, t in zip(x.shape, shape)]
    if all(p == (0, 0) for p in pads):
        return x
    return jnp.pad(x, pads)


def _vmem_capacity_bytes():
    try:
        info = pltpu.get_tpu_info()
        cap = getattr(info, "vmem_capacity_bytes", None)
        if cap:
            return int(cap)
    except Exception:
        pass
    return 128 << 20


def _vmem_budgets():
    """(tile budget, vmem_limit cap) per TPU generation."""
    cap = _vmem_capacity_bytes()
    if cap <= (64 << 20) + (1 << 20):          # v7x-class: 64 MiB per TC
        return 40 << 20, 52 << 20
    return 88 << 20, 100 << 20                 # v5e / v6e: 128 MiB


def _vmem_limit(need_bytes, limit_cap):
    lim = max(need_bytes + (4 << 20), 32 << 20)
    return int(min(lim, max(limit_cap, need_bytes + (2 << 20))))


def _const_block_spec(block_shape):
    """BlockSpec for a block that never changes across the grid.

    Single-buffered (pipeline_mode=pl.Buffered(1)) when supported so constant
    weights/biases are not duplicated in VMEM; falls back to the default spec.
    """
    ndim = len(block_shape)
    index_map = lambda *_: (0,) * ndim
    try:
        return pl.BlockSpec(block_shape, index_map, pipeline_mode=pl.Buffered(1))
    except Exception:
        return pl.BlockSpec(block_shape, index_map)


def _choose_batch_tile(batch, per_sample_bytes, budget, min_steps=4):
    """Largest batch tile that fits `budget`, keeps >= min_steps grid steps on
    the parallel batch axis when the batch allows it (pipelining + v7x
    megacore), divides the batch, and is a multiple of 8 (2-D sublane
    constraint) unless it equals the full batch."""
    max_tb = max(1, budget // max(1, per_sample_bytes))
    if batch >= 8 * min_steps:
        # never let the parallel axis collapse to a single step
        max_tb = min(max_tb, batch // min_steps)
    if max_tb >= batch:
        return batch
    # prefer MXU / pipeline friendly multiples, largest first
    for align in (256, 128, 64, 32, 16, 8):
        cand = (max_tb // align) * align
        if cand >= align and batch % cand == 0:
            return cand
    tb = (max_tb // 8) * 8
    while tb >= 8:
        if batch % tb == 0:
            return tb
        tb -= 8
    return batch   # no legal smaller tile; full batch (block == full dim)


def _choose_seq_chunk(S, target_ts=256, align=16):
    """Pad S to a sublane-friendly size and pick the seq chunk (multiple of
    128 when it is smaller than the padded S)."""
    Sp = _round_up(S, align)
    if Sp <= target_ts:
        return Sp, Sp
    return _round_up(S, target_ts), target_ts


# ------------------------------ wrappers -----------------------------------

def text_encode(token_embs, attention_mask, w_proj, b_proj):
    """token_embs [B,S,Hp] bf16, mask [B,S] f32, w [Hp,Dp] bf16, b [1,Dp] f32."""
    B, S, Hp = token_embs.shape
    Dp = w_proj.shape[1]

    Sp, ts = _choose_seq_chunk(S)
    if Sp != S:
        token_embs = _pad_to(token_embs, (B, Sp, Hp))
        attention_mask = _pad_to(attention_mask, (B, Sp))
    gs = Sp // ts

    budget, limit_cap = _vmem_budgets()
    weight_bytes = 2 * (w_proj.size * w_proj.dtype.itemsize + b_proj.size * 4)
    per_sample = (2 * ts * Hp * 2        # bf16 embs chunk, double-buffered
                  + 2 * ts * 4           # mask chunk, double-buffered
                  + 2 * ts * Hp * 4      # in-kernel f32 upcast + masked product
                  + Hp * 4 + 4           # accumulators
                  + 2 * Dp * 4)          # output block, double-buffered
    tb = _choose_batch_tile(B, per_sample, max(budget - weight_bytes, 4 << 20))
    gb = B // tb
    need = tb * per_sample + weight_bytes

    flops = 2 * B * Sp * Hp + 2 * B * Hp * Dp + 3 * B * Dp
    bytes_accessed = (token_embs.size * token_embs.dtype.itemsize
                      + attention_mask.size * 4
                      + w_proj.size * 2 + b_proj.size * 4 + B * Dp * 4)

    return pl.pallas_call(
        _text_kernel,
        out_shape=jax.ShapeDtypeStruct((B, Dp), jnp.float32),
        grid=(gb, gs),
        in_specs=[
            pl.BlockSpec((tb, ts, Hp), lambda i, s: (i, s, 0)),
            pl.BlockSpec((tb, ts), lambda i, s: (i, s)),
            _const_block_spec((Hp, Dp)),
            _const_block_spec((1, Dp)),
        ],
        out_specs=pl.BlockSpec((tb, Dp), lambda i, s: (i, 0)),
        scratch_shapes=[pltpu.VMEM((tb, Hp), jnp.float32),
                        pltpu.VMEM((tb, 1), jnp.float32)],
        compiler_params=pltpu.CompilerParams(
            dimension_semantics=("parallel", "arbitrary"),
            vmem_limit_bytes=_vmem_limit(need, limit_cap)),
        cost_estimate=pl.CostEstimate(flops=int(flops), transcendentals=int(B),
                                      bytes_accessed=int(bytes_accessed)),
    )(token_embs, attention_mask, w_proj, b_proj)


def image_encode(pooled_patches, w_patch, b_patch, w_head, b_head):
    """pooled [B,pdp] bf16, wp [pdp,Hvp] bf16, wh [Hvp,Dp] bf16, biases f32."""
    B, pdp = pooled_patches.shape
    Hvp = w_patch.shape[1]
    Dp = w_head.shape[1]

    budget, limit_cap = _vmem_budgets()
    weight_bytes = 2 * (w_patch.size * 2 + w_head.size * 2
                        + b_patch.size * 4 + b_head.size * 4)
    per_sample = (2 * pdp * 2            # bf16 input block, double-buffered
                  + Hvp * 4              # hidden activations (f32)
                  + 2 * Dp * 4)          # output block, double-buffered
    tb = _choose_batch_tile(B, per_sample, max(budget - weight_bytes, 4 << 20))
    gb = B // tb
    need = tb * per_sample + weight_bytes

    flops = 2 * B * pdp * Hvp + 2 * B * Hvp * Dp + 3 * B * Dp
    bytes_accessed = (pooled_patches.size * 2 + w_patch.size * 2
                      + w_head.size * 2 + b_patch.size * 4 + b_head.size * 4
                      + B * Dp * 4)

    return pl.pallas_call(
        _image_kernel,
        out_shape=jax.ShapeDtypeStruct((B, Dp), jnp.float32),
        grid=(gb,),
        in_specs=[
            pl.BlockSpec((tb, pdp), lambda i: (i, 0)),
            _const_block_spec((pdp, Hvp)),
            _const_block_spec((1, Hvp)),
            _const_block_spec((Hvp, Dp)),
            _const_block_spec((1, Dp)),
        ],
        out_specs=pl.BlockSpec((tb, Dp), lambda i: (i, 0)),
        compiler_params=pltpu.CompilerParams(
            dimension_semantics=("parallel",),
            vmem_limit_bytes=_vmem_limit(need, limit_cap)),
        cost_estimate=pl.CostEstimate(flops=int(flops), transcendentals=int(B),
                                      bytes_accessed=int(bytes_accessed)),
    )(pooled_patches, w_patch, b_patch, w_head, b_head)


def mclip_forward(image, input_ids, attention_mask, params, patch_size):
    """mCLIP.forward: returns (image_features, text_features, logit_scale.exp())."""
    D = params["w_text"].shape[1]
    Dp = _round_up(D, 128)

    # ---- text branch ----
    # TODO(synk): the pretrained XLM-RoBERTa / mDeBERTa backbone is an external
    # HF model; a deterministic embedding-table lookup stands in for
    # transformer(input_ids, attention_mask)[0].
    token_embs = params["tok_emb"][input_ids]                      # [B, S, H]
    B, S, Htxt = token_embs.shape
    Hp = _round_up(Htxt, 128)
    token_embs = _pad_to(token_embs, (B, S, Hp)).astype(jnp.bfloat16)
    w_text = _pad_to(params["w_text"], (Hp, Dp)).astype(jnp.bfloat16)
    b_text = _pad_to(params["b_text"], (1, Dp)).astype(jnp.float32)
    text_features = text_encode(
        token_embs, attention_mask.astype(jnp.float32), w_text, b_text)[:, :D]

    # ---- image branch ----
    # TODO(synk): the ViT transformer blocks of VisualTransformer are not
    # reproduced; a mean pool over patch tokens stands in for the token mixer.
    # While the stand-in is a (linear) mean pool it commutes in front of the
    # conv1-as-matmul patch embedding, so the pooling happens here on the raw
    # NCHW image and the kernel never streams the [B, P, C*ph*pw] patch tensor.
    B_i, C, Himg, Wimg = image.shape
    ph = pw = patch_size
    pd = C * ph * pw
    pdp = _round_up(pd, 128)
    pooled = image.reshape(B_i, C, Himg // ph, ph, Wimg // pw, pw).mean(axis=(2, 4))
    pooled = pooled.reshape(B_i, pd)          # channel-major per patch (conv weight layout)
    pooled = _pad_to(pooled, (B_i, pdp)).astype(jnp.bfloat16)

    Hv = params["w_patch"].shape[1]
    Hvp = _round_up(Hv, 128)
    w_patch = _pad_to(params["w_patch"], (pdp, Hvp)).astype(jnp.bfloat16)
    b_patch = _pad_to(params["b_patch"], (1, Hvp)).astype(jnp.float32)
    w_head = _pad_to(params["w_head"], (Hvp, Dp)).astype(jnp.bfloat16)
    b_head = _pad_to(params["b_head"], (1, Dp)).astype(jnp.float32)
    image_features = image_encode(pooled, w_patch, b_patch, w_head, b_head)[:, :D]

    logit_scale = jnp.exp(params["logit_scale"])
    return image_features, text_features, logit_scale


# ------------------------------ demo / main --------------------------------

if __name__ == "__main__":
    # small shapes consistent with the forward pass
    B, S, Hdim, D = 2, 8, 32, 16          # batch, seq, transformer hidden, CLIP dim
    C, IMG, PATCH = 3, 16, 8              # image channels, spatial, patch size
    HV = 32                               # visual hidden width
    VOCAB = 64

    key = jax.random.PRNGKey(0)
    keys = jax.random.split(key, 10)

    params = {
        # text-side synthetic transformer output table + projection (Linear(H, D))
        "tok_emb": jax.random.normal(keys[0], (VOCAB, Hdim), jnp.float32) * 0.02,
        "w_text":  jax.random.normal(keys[1], (Hdim, D), jnp.float32) * 0.05,
        "b_text":  jax.random.normal(keys[2], (1, D), jnp.float32) * 0.01,
        # visual patch embedding + projection head
        "w_patch": jax.random.normal(keys[3], (C * PATCH * PATCH, HV), jnp.float32) * 0.05,
        "b_patch": jax.random.normal(keys[4], (1, HV), jnp.float32) * 0.01,
        "w_head":  jax.random.normal(keys[5], (HV, D), jnp.float32) * 0.05,
        "b_head":  jax.random.normal(keys[6], (1, D), jnp.float32) * 0.01,
        # CLIP logit scale parameter (ln(1/0.07) as in CLIP)
        "logit_scale": jnp.asarray(2.6592, jnp.float32),
    }

    image = jax.random.normal(keys[7], (B, C, IMG, IMG), jnp.float32)
    input_ids = jax.random.randint(keys[8], (B, S), 0, VOCAB)
    attention_mask = jnp.array([[1, 1, 1, 1, 1, 1, 1, 1],
                                [1, 1, 1, 1, 1, 0, 0, 0]], jnp.int32)

    fwd = jax.jit(mclip_forward, static_argnames=("patch_size",))
    img_feats, txt_feats, scale = fwd(image, input_ids, attention_mask, params,
                                      patch_size=PATCH)
    jax.block_until_ready((img_feats, txt_feats, scale))

    assert img_feats.shape == (B, D) and txt_feats.shape == (B, D)
    # L2-normalized rows (padded columns are exactly zero, so slicing back to D
    # preserves unit norm)
    assert jnp.allclose(jnp.linalg.norm(img_feats, axis=-1), 1.0, atol=1e-4)
    assert jnp.allclose(jnp.linalg.norm(txt_feats, axis=-1), 1.0, atol=1e-4)

    # pure-JAX reference (same bf16-cast operands) parity spot-check
    te = params["tok_emb"][input_ids].astype(jnp.bfloat16).astype(jnp.float32)
    m = attention_mask.astype(jnp.float32)
    pooled_t = (te * m[:, :, None]).sum(1) / m.sum(1, keepdims=True)
    txt_ref = (pooled_t.astype(jnp.bfloat16).astype(jnp.float32)
               @ params["w_text"].astype(jnp.bfloat16).astype(jnp.float32)
               + params["b_text"])
    txt_ref = txt_ref / jnp.linalg.norm(txt_ref, axis=-1, keepdims=True)
    pm = image.reshape(B, C, IMG // PATCH, PATCH, IMG // PATCH, PATCH)
    pm = pm.mean(axis=(2, 4)).reshape(B, -1)
    x_ref = (pm.astype(jnp.bfloat16).astype(jnp.float32)
             @ params["w_patch"].astype(jnp.bfloat16).astype(jnp.float32)
             + params["b_patch"])
    img_ref = (x_ref.astype(jnp.bfloat16).astype(jnp.float32)
               @ params["w_head"].astype(jnp.bfloat16).astype(jnp.float32)
               + params["b_head"])
    img_ref = img_ref / jnp.linalg.norm(img_ref, axis=-1, keepdims=True)
    assert jnp.allclose(txt_feats, txt_ref, atol=2e-2)
    assert jnp.allclose(img_feats, img_ref, atol=2e-2)
    assert jnp.allclose(scale, jnp.exp(params["logit_scale"]))

    print("KERNEL_OK")
</pallas_src>

<mosaic_0001>
module attributes {stable_mosaic.version = 11 : i64} {
  func.func @_image_kernel(%arg0: i32, %arg1: memref<2x256xbf16, #tpu.memory_space<vmem>>, %arg2: memref<256x128xbf16, #tpu.memory_space<vmem>>, %arg3: memref<1x128xf32, #tpu.memory_space<vmem>>, %arg4: memref<128x128xbf16, #tpu.memory_space<vmem>>, %arg5: memref<1x128xf32, #tpu.memory_space<vmem>>, %arg6: memref<2x128xf32, #tpu.memory_space<vmem>>) attributes {dimension_semantics = [#tpu.dimension_semantics<parallel>], iteration_bounds = array<i64: 1>, scalar_prefetch = 0 : i64, scratch_operands = 0 : i64, tpu.core_type = #tpu.core_type<tc>, window_params = [{transform_indices = @transform_0, window_bounds = array<i64: 2, 256>}, {pipeline_mode = #tpu.pipeline_mode<synchronous>, transform_indices = @transform_1, window_bounds = array<i64: 256, 128>}, {pipeline_mode = #tpu.pipeline_mode<synchronous>, transform_indices = @transform_2, window_bounds = array<i64: 1, 128>}, {pipeline_mode = #tpu.pipeline_mode<synchronous>, transform_indices = @transform_3, window_bounds = array<i64: 128, 128>}, {pipeline_mode = #tpu.pipeline_mode<synchronous>, transform_indices = @transform_4, window_bounds = array<i64: 1, 128>}, {transform_indices = @transform_5, window_bounds = array<i64: 2, 128>}]} {
    %c0 = arith.constant 0 : index
    %c0_0 = arith.constant 0 : index
    %0 = vector.load %arg1[%c0, %c0_0] : memref<2x256xbf16, #tpu.memory_space<vmem>>, vector<2x256xbf16>
    %c0_1 = arith.constant 0 : index
    %c0_2 = arith.constant 0 : index
    %1 = vector.load %arg2[%c0_1, %c0_2] : memref<256x128xbf16, #tpu.memory_space<vmem>>, vector<256x128xbf16>
    %cst = arith.constant dense<0.000000e+00> : vector<2x128xf32>
    %2 = tpu.matmul %0, %1, %cst {dimension_numbers = #tpu.dot_dimension_numbers<[1], [0], [0], [1], [0, 0, 1, 1], [], []>} : vector<2x256xbf16>, vector<256x128xbf16>, vector<2x128xf32> -> vector<2x128xf32>
    %c0_3 = arith.constant 0 : index
    %c0_4 = arith.constant 0 : index
    %3 = vector.load %arg3[%c0_3, %c0_4] : memref<1x128xf32, #tpu.memory_space<vmem>>, vector<1x128xf32>
    %4 = vector.broadcast %3 : vector<1x128xf32> to vector<2x128xf32>
    %5 = arith.addf %2, %4 : vector<2x128xf32>
    %6 = arith.truncf %5 : vector<2x128xf32> to vector<2x128xbf16>
    %c0_5 = arith.constant 0 : index
    %c0_6 = arith.constant 0 : index
    %7 = vector.load %arg4[%c0_5, %c0_6] : memref<128x128xbf16, #tpu.memory_space<vmem>>, vector<128x128xbf16>
    %cst_7 = arith.constant dense<0.000000e+00> : vector<2x128xf32>
    %8 = tpu.matmul %6, %7, %cst_7 {dimension_numbers = #tpu.dot_dimension_numbers<[1], [0], [0], [1], [0, 0, 1, 1], [], []>} : vector<2x128xbf16>, vector<128x128xbf16>, vector<2x128xf32> -> vector<2x128xf32>
    %c0_8 = arith.constant 0 : index
    %c0_9 = arith.constant 0 : index
    %9 = vector.load %arg5[%c0_8, %c0_9] : memref<1x128xf32, #tpu.memory_space<vmem>>, vector<1x128xf32>
    %10 = vector.broadcast %9 : vector<1x128xf32> to vector<2x128xf32>
    %11 = arith.addf %8, %10 : vector<2x128xf32>
    %12 = arith.mulf %11, %11 : vector<2x128xf32>
    %cst_10 = arith.constant dense<0.000000e+00> : vector<2xf32>
    %13 = vector.multi_reduction <add>, %12, %cst_10 [1] : vector<2x128xf32> to vector<2xf32>
    %14 = vector.shape_cast %13 : vector<2xf32> to vector<2x1xf32>
    %cst_11 = arith.constant 1.000000e-24 : f32
    %15 = vector.broadcast %cst_11 : f32 to vector<2x1xf32>
    %16 = arith.maximumf %14, %15 : vector<2x1xf32>
    %17 = math.rsqrt %16 : vector<2x1xf32>
    %18 = vector.broadcast %17 : vector<2x1xf32> to vector<2x128xf32>
    %19 = arith.mulf %11, %18 : vector<2x128xf32>
    %c0_12 = arith.constant 0 : index
    %c0_13 = arith.constant 0 : index
    %20 = vector.load %arg6[%c0_12, %c0_13] : memref<2x128xf32, #tpu.memory_space<vmem>>, vector<2x128xf32>
    tpu.vector_store %arg6[%c0_12, %c0_13], %19 {strides = array<i32>} : memref<2x128xf32, #tpu.memory_space<vmem>>, vector<2x128xf32>,
    return
  }
  func.func @transform_0(%arg0: i32) -> (i32, i32) {
    %c0_i32 = arith.constant 0 : i32
    %c0_i32_0 = arith.constant 0 : i32
    return %arg0, %c0_i32 : i32, i32
  }
  func.func @transform_1(%arg0: i32) -> (i32, i32) {
    %c0_i32 = arith.constant 0 : i32
    %c0_i32_0 = arith.constant 0 : i32
    %c0_i32_1 = arith.constant 0 : i32
    return %c0_i32, %c0_i32_0 : i32, i32
  }
  func.func @transform_2(%arg0: i32) -> (i32, i32) {
    %c0_i32 = arith.constant 0 : i32
    %c0_i32_0 = arith.constant 0 : i32
    %c0_i32_1 = arith.constant 0 : i32
    return %c0_i32, %c0_i32_0 : i32, i32
  }
  func.func @transform_3(%arg0: i32) -> (i32, i32) {
    %c0_i32 = arith.constant 0 : i32
    %c0_i32_0 = arith.constant 0 : i32
    %c0_i32_1 = arith.constant 0 : i32
    return %c0_i32, %c0_i32_0 : i32, i32
  }
  func.func @transform_4(%arg0: i32) -> (i32, i32) {
    %c0_i32 = arith.constant 0 : i32
    %c0_i32_0 = arith.constant 0 : i32
    %c0_i32_1 = arith.constant 0 : i32
    return %c0_i32, %c0_i32_0 : i32, i32
  }
  func.func @transform_5(%arg0: i32) -> (i32, i32) {
    %c0_i32 = arith.constant 0 : i32
    %c0_i32_0 = arith.constant 0 : i32
    return %arg0, %c0_i32 : i32, i32
  }
}

module attributes {stable_mosaic.version = 11 : i64} {
  func.func @_text_kernel(%arg0: i32, %arg1: i32, %arg2: memref<2x16x128xbf16, #tpu.memory_space<vmem>>, %arg3: memref<2x16xf32, #tpu.memory_space<vmem>>, %arg4: memref<128x128xbf16, #tpu.memory_space<vmem>>, %arg5: memref<1x128xf32, #tpu.memory_space<vmem>>, %arg6: memref<2x128xf32, #tpu.memory_space<vmem>>, %arg7: memref<2x128xf32, #tpu.memory_space<vmem>>, %arg8: memref<2x1xf32, #tpu.memory_space<vmem>>) attributes {dimension_semantics = [#tpu.dimension_semantics<parallel>, #tpu.dimension_semantics<arbitrary>], iteration_bounds = array<i64: 1, 1>, scalar_prefetch = 0 : i64, scratch_operands = 2 : i64, tpu.core_type = #tpu.core_type<tc>, window_params = [{transform_indices = @transform_0, window_bounds = array<i64: 2, 16, 128>}, {transform_indices = @transform_1, window_bounds = array<i64: 2, 16>}, {pipeline_mode = #tpu.pipeline_mode<synchronous>, transform_indices = @transform_2, window_bounds = array<i64: 128, 128>}, {pipeline_mode = #tpu.pipeline_mode<synchronous>, transform_indices = @transform_3, window_bounds = array<i64: 1, 128>}, {transform_indices = @transform_4, window_bounds = array<i64: 2, 128>}]} {
    %c0_i32 = arith.constant 0 : i32
    %0 = arith.cmpi eq, %arg1, %c0_i32 : i32
    %1 = arith.extui %0 : i1 to i32
    %c0_i32_0 = arith.constant 0 : i32
    %2 = arith.cmpi ne, %1, %c0_i32_0 : i32
    scf.if %2 {
      %cst_16 = arith.constant 0.000000e+00 : f32
      %21 = vector.broadcast %cst_16 : f32 to vector<2x128xf32>
      %c0_17 = arith.constant 0 : index
      %c0_18 = arith.constant 0 : index
      %22 = vector.load %arg7[%c0_17, %c0_18] : memref<2x128xf32, #tpu.memory_space<vmem>>, vector<2x128xf32>
      tpu.vector_store %arg7[%c0_17, %c0_18], %21 {strides = array<i32>} : memref<2x128xf32, #tpu.memory_space<vmem>>, vector<2x128xf32>,
      %cst_19 = arith.constant 0.000000e+00 : f32
      %23 = vector.broadcast %cst_19 : f32 to vector<2x1xf32>
      %c0_20 = arith.constant 0 : index
      %c0_21 = arith.constant 0 : index
      %24 = vector.load %arg8[%c0_20, %c0_21] : memref<2x1xf32, #tpu.memory_space<vmem>>, vector<2x1xf32>
      tpu.vector_store %arg8[%c0_20, %c0_21], %23 {strides = array<i32>} : memref<2x1xf32, #tpu.memory_space<vmem>>, vector<2x1xf32>,
    } else {
    }
    %c0 = arith.constant 0 : index
    %c0_1 = arith.constant 0 : index
    %c0_2 = arith.constant 0 : index
    %3 = vector.load %arg2[%c0, %c0_1, %c0_2] : memref<2x16x128xbf16, #tpu.memory_space<vmem>>, vector<2x16x128xbf16>
    %4 = arith.extf %3 : vector<2x16x128xbf16> to vector<2x16x128xf32>
    %c0_3 = arith.constant 0 : index
    %c0_4 = arith.constant 0 : index
    %5 = vector.load %arg3[%c0_3, %c0_4] : memref<2x16xf32, #tpu.memory_space<vmem>>, vector<2x16xf32>
    %c0_5 = arith.constant 0 : index
    %c0_6 = arith.constant 0 : index
    %6 = vector.load %arg7[%c0_5, %c0_6] : memref<2x128xf32, #tpu.memory_space<vmem>>, vector<2x128xf32>
    %7 = vector.shape_cast %5 : vector<2x16xf32> to vector<2x16x1xf32>
    %8 = vector.broadcast %7 : vector<2x16x1xf32> to vector<2x16x128xf32>
    %9 = arith.mulf %4, %8 : vector<2x16x128xf32>
    %cst = arith.constant dense<0.000000e+00> : vector<2x128xf32>
    %10 = vector.multi_reduction <add>, %9, %cst [1] : vector<2x16x128xf32> to vector<2x128xf32>
    %11 = arith.addf %6, %10 : vector<2x128xf32>
    %c0_7 = arith.constant 0 : index
    %c0_8 = arith.constant 0 : index
    %12 = vector.load %arg7[%c0_7, %c0_8] : memref<2x128xf32, #tpu.memory_space<vmem>>, vector<2x128xf32>
    tpu.vector_store %arg7[%c0_7, %c0_8], %11 {strides = array<i32>} : memref<2x128xf32, #tpu.memory_space<vmem>>, vector<2x128xf32>,
    %c0_9 = arith.constant 0 : index
    %c0_10 = arith.constant 0 : index
    %13 = vector.load %arg8[%c0_9, %c0_10] : memref<2x1xf32, #tpu.memory_space<vmem>>, vector<2x1xf32>
    %cst_11 = arith.constant dense<0.000000e+00> : vector<2xf32>
    %14 = vector.multi_reduction <add>, %5, %cst_11 [1] : vector<2x16xf32> to vector<2xf32>
    %15 = vector.shape_cast %14 : vector<2xf32> to vector<2x1xf32>
    %16 = arith.addf %13, %15 : vector<2x1xf32>
    %c0_12 = arith.constant 0 : index
    %c0_13 = arith.constant 0 : index
    %17 = vector.load %arg8[%c0_12, %c0_13] : memref<2x1xf32, #tpu.memory_space<vmem>>, vector<2x1xf32>
    tpu.vector_store %arg8[%c0_12, %c0_13], %16 {strides = array<i32>} : memref<2x1xf32, #tpu.memory_space<vmem>>, vector<2x1xf32>,
    %c0_i32_14 = arith.constant 0 : i32
    %18 = arith.cmpi eq, %arg1, %c0_i32_14 : i32
    %19 = arith.extui %18 : i1 to i32
    %c0_i32_15 = arith.constant 0 : i32
    %20 = arith.cmpi ne, %19, %c0_i32_15 : i32
    scf.if %20 {
      %c0_16 = arith.constant 0 : index
      %c0_17 = arith.constant 0 : index
      %21 = vector.load %arg7[%c0_16, %c0_17] : memref<2x128xf32, #tpu.memory_space<vmem>>, vector<2x128xf32>
      %c0_18 = arith.constant 0 : index
      %c0_19 = arith.constant 0 : index
      %22 = vector.load %arg8[%c0_18, %c0_19] : memref<2x1xf32, #tpu.memory_space<vmem>>, vector<2x1xf32>
      %23 = vector.broadcast %22 : vector<2x1xf32> to vector<2x128xf32>
      %24 = arith.divf %21, %23 : vector<2x128xf32>
      %25 = arith.truncf %24 : vector<2x128xf32> to vector<2x128xbf16>
      %c0_20 = arith.constant 0 : index
      %c0_21 = arith.constant 0 : index
      %26 = vector.load %arg4[%c0_20, %c0_21] : memref<128x128xbf16, #tpu.memory_space<vmem>>, vector<128x128xbf16>
      %cst_22 = arith.constant dense<0.000000e+00> : vector<2x128xf32>
      %27 = tpu.matmul %25, %26, %cst_22 {dimension_numbers = #tpu.dot_dimension_numbers<[1], [0], [0], [1], [0, 0, 1, 1], [], []>} : vector<2x128xbf16>, vector<128x128xbf16>, vector<2x128xf32> -> vector<2x128xf32>
      %c0_23 = arith.constant 0 : index
      %c0_24 = arith.constant 0 : index
      %28 = vector.load %arg5[%c0_23, %c0_24] : memref<1x128xf32, #tpu.memory_space<vmem>>, vector<1x128xf32>
      %29 = vector.broadcast %28 : vector<1x128xf32> to vector<2x128xf32>
      %30 = arith.addf %27, %29 : vector<2x128xf32>
      %31 = arith.mulf %30, %30 : vector<2x128xf32>
      %cst_25 = arith.constant dense<0.000000e+00> : vector<2xf32>
      %32 = vector.multi_reduction <add>, %31, %cst_25 [1] : vector<2x128xf32> to vector<2xf32>
      %33 = vector.shape_cast %32 : vector<2xf32> to vector<2x1xf32>
      %cst_26 = arith.constant 1.000000e-24 : f32
      %34 = vector.broadcast %cst_26 : f32 to vector<2x1xf32>
      %35 = arith.maximumf %33, %34 : vector<2x1xf32>
      %36 = math.rsqrt %35 : vector<2x1xf32>
      %37 = vector.broadcast %36 : vector<2x1xf32> to vector<2x128xf32>
      %38 = arith.mulf %30, %37 : vector<2x128xf32>
      %c0_27 = arith.constant 0 : index
      %c0_28 = arith.constant 0 : index
      %39 = vector.load %arg6[%c0_27, %c0_28] : memref<2x128xf32, #tpu.memory_space<vmem>>, vector<2x128xf32>
      tpu.vector_store %arg6[%c0_27, %c0_28], %38 {strides = array<i32>} : memref<2x128xf32, #tpu.memory_space<vmem>>, vector<2x128xf32>,
    } else {
    }
    return
  }
  func.func @transform_0(%arg0: i32, %arg1: i32) -> (i32, i32, i32) {
    %c0_i32 = arith.constant 0 : i32
    %c0_i32_0 = arith.constant 0 : i32
    return %arg0, %arg1, %c0_i32 : i32, i32, i32
  }
  func.func @transform_1(%arg0: i32, %arg1: i32) -> (i32, i32) {
    %c0_i32 = arith.constant 0 : i32
    return %arg0, %arg1 : i32, i32
  }
  func.func @transform_2(%arg0: i32, %arg1: i32) -> (i32, i32) {
    %c0_i32 = arith.constant 0 : i32
    %c0_i32_0 = arith.constant 0 : i32
    %c0_i32_1 = arith.constant 0 : i32
    return %c0_i32, %c0_i32_0 : i32, i32
  }
  func.func @transform_3(%arg0: i32, %arg1: i32) -> (i32, i32) {
    %c0_i32 = arith.constant 0 : i32
    %c0_i32_0 = arith.constant 0 : i32
    %c0_i32_1 = arith.constant 0 : i32
    return %c0_i32, %c0_i32_0 : i32, i32
  }
  func.func @transform_4(%arg0: i32, %arg1: i32) -> (i32, i32) {
    %c0_i32 = arith.constant 0 : i32
    %c0_i32_0 = arith.constant 0 : i32
    return %arg0, %c0_i32 : i32, i32
  }
}

</mosaic_0001>

<bundles_post_ra>
// kernel: mclip_forward.3
= control target key start
LH: loop header
LB: loop body
LE: loop exit
PB: predicated region body
PF: predicated region fallthrough
CT: control target
= control target key end

     0   :  { %s568_s0 = inlined_call_operand.vmem [shape: bf16[2,256], index: 0, kind: input, shape index: {}]   ;;  %s569_s1 = inlined_call_operand.vmem [shape: bf16[256,128], index: 1, kind: input, shape index: {}]   ;;  %s570_s2 = inlined_call_operand.vmem [shape: f32[1,128], index: 2, kind: input, shape index: {}]   ;;  %s571_s3 = inlined_call_operand.vmem [shape: bf16[128,128], index: 3, kind: input, shape index: {}]   ;;  %s572_s4 = inlined_call_operand.vmem [shape: f32[1,128], index: 4, kind: input, shape index: {}]   ;;  %s573_s5 = inlined_call_operand.hbm [shape: f32[2,128], index: 5, kind: output, shape index: {}]  }
   0x1   :  { %v405_v0 = vld [vmem:[%s569_s1 + $0x38] sm:$0xff]  ;;  %v404_v2 = vld [vmem:[%s569_s1 + $0x30] sm:$0xff]  ;;  %v21_v4 = vld [vmem:[%s568_s0] sm:$0x3] }
   0x2   :  { %v413_v1 = vld [vmem:[%s569_s1 + $0x78] sm:$0xff]  ;;  %160 = vmatpush.bf16.msra.mxu0 %v405_v0  ;;  %v412_v3 = vld [vmem:[%s569_s1 + $0x70] sm:$0xff]  ;;  %v403_v6 = vld [vmem:[%s569_s1 + $0x28] sm:$0xff]  ;;  %59 = vst [vmem:[#allocation1] ss:$9 sm:$0xff] %v21_v4 }
   0x3   :  { %173 = vmatpush.bf16.msra.mxu1 %v413_v1  ;;  %v421_v5 = vld [vmem:[%s571_s3 + $0x38] sm:$0xff]  ;;  %v411_v7 = vld [vmem:[%s569_s1 + $0x68] sm:$0xff]  ;;  %v420_v8 = vld [vmem:[%s571_s3 + $0x30] sm:$0xff] }
   0x4   :  { %255 = vmatpush.bf16.msra.mxu2 %v421_v5 }
   0x6   :  { %161 = vmatpush.bf16.msra.mxu0 %v404_v2 }
   0x7   :  { %174 = vmatpush.bf16.msra.mxu1 %v412_v3 }
   0x8   :  { %10 = vsyncpa [#allocation3], 0  ;;  %v402_v9 = vld [vmem:[%s569_s1 + $0x20] sm:$0xff]  ;;  %256 = vmatpush.bf16.msra.mxu2 %v420_v8  ;;  %v419_v11 = vld [vmem:[%s571_s3 + $0x28] sm:$0xff]  ;;  %vm269_vm0 = vcmask 1041408   ;;  %s293_s20 = sshll.u32 %s573_s5, 4  ;;  %s294_s20 = int_to_ptr.hbm [resolvable:$true] %s293_s20 }
   0x9   :  { %v410_v10 = vld [vmem:[%s569_s1 + $0x60] sm:$0xff]  ;;  %v401_v12 = vld [vmem:[%s569_s1 + $0x18] sm:$0xff]  ;;  %v400_v15 = vld [vmem:[%s569_s1 + $0x10] sm:$0xff] }
   0xa   :  { %162 = vmatpush.bf16.msra.mxu0 %v403_v6  ;;  %v409_v13 = vld [vmem:[%s569_s1 + $0x58] sm:$0xff]  ;;  %v418_v14 = vld [vmem:[%s571_s3 + $0x20] sm:$0xff]  ;;  %v408_v16 = vld [vmem:[%s569_s1 + $0x50] sm:$0xff] }
   0xb   :  { %175 = vmatpush.bf16.msra.mxu1 %v411_v7  ;;  %v417_v17 = vld [vmem:[%s571_s3 + $0x18] sm:$0xff]  ;;  %v399_v18 = vld [vmem:[%s569_s1 + $0x8] sm:$0xff]  ;;  %v416_v20 = vld [vmem:[%s571_s3 + $0x10] sm:$0xff] }
   0xc   :  { %257 = vmatpush.bf16.msra.mxu2 %v419_v11  ;;  %v407_v19 = vld [vmem:[%s569_s1 + $0x48] sm:$0xff]  ;;  %v398_v21 = vld [vmem:[%s569_s1] sm:$0xff] }
   0xd   :  { %v406_v22 = vld [vmem:[%s569_s1 + $0x40] sm:$0xff]  ;;  %v61_v24 = vld [vmem:[#allocation1 + $0x9] sm:$0xff] }
   0xe   :  { %163 = vmatpush.bf16.msra.mxu0 %v402_v9  ;;  %v60_v23 = vld [vmem:[#allocation1] sm:$0xff]  ;;  %v415_v25 = vld [vmem:[%s571_s3 + $0x8] sm:$0xff] }
   0xf   :  { %176 = vmatpush.bf16.msra.mxu1 %v410_v10  ;;  %v414_v26 = vld [vmem:[%s571_s3] sm:$0xff] }
  0x10   :  { %258 = vmatpush.bf16.msra.mxu2 %v418_v14  ;;  %v423_v27 = vld [vmem:[%s570_s2] ss:$0 sm:$0xff]  ;;  %s453_s2 = smov [#allocation2]  }
  0x11   :  { %v424_v35 = vld [vmem:[%s572_s4] ss:$0 sm:$0xff]  ;;  %s291_s3 = sshll.u32 %s453_s2, 4  ;;  %s292_s3 = int_to_ptr.vmem [resolvable:$true] %s291_s3 }
  0x12   :  { %164 = vmatpush.bf16.msra.mxu0 %v401_v12 }
  0x13   :  { %177 = vmatpush.bf16.msra.mxu1 %v409_v13 }
  0x14   :  { %259 = vmatpush.bf16.msra.mxu2 %v417_v17 }
  0x16   :  { %165 = vmatpush.bf16.msra.mxu0 %v400_v15 }
  0x17   :  { %178 = vmatpush.bf16.msra.mxu1 %v408_v16 }
  0x18   :  { %260 = vmatpush.bf16.msra.mxu2 %v416_v20 }
  0x1a   :  { %166 = vmatpush.bf16.msra.mxu0 %v399_v18 }
  0x1b   :  { %179 = vmatpush.bf16.msra.mxu1 %v407_v19 }
  0x1c   :  { %261 = vmatpush.bf16.msra.mxu2 %v415_v25 }
  0x1e   :  { %167 = vmatpush.bf16.msra.mxu0 %v398_v21 }
  0x1f   :  { %180 = vmatpush.bf16.msra.mxu1 %v406_v22 }
  0x20   :  { %262 = vmatpush.bf16.msra.mxu2 %v414_v26 }
  0x21   :  { %168 = vmatmul.bf16.vlgmr.msra.gmra.mxu0 %v60_v23 }
  0x22   :  { %181 = vmatmul.bf16.vlgmr.msra.gmra.mxu1 %v61_v24 }
  0x9e   :  { %v169_v28 = vpop.f32.mrf.mxu0 }
  0x9f   :  { %v182_v29 = vpop.f32.mrf.mxu1  ;;  %v170_v30 = vadd.f32 %v423_v27, %v169_v28 }
  0xa1   :  { %v183_v31 = vadd.f32 %v182_v29, %v170_v30 }
  0xa3   :  { %v186_v32 = vpack.c.bf16 %v183_v31, %v183_v31 }
  0xa5   :  { %263 = vmatmul.bf16.vlgmr.msra.gmra.mxu2 %v186_v32 }
  0xa6   :  { %v171_v33 = vpop.f32.mrf.mxu0 }
  0xa7   :  { %v184_v34 = vpop.f32.mrf.mxu1 }
 0x128   :  { %v264_v36 = vpop.f32.mrf.mxu2 }
 0x129   :  { %v265_v37 = vadd.f32 %v424_v35, %v264_v36 }
 0x12b   :  { %v268_v38 = vmul.f32 %v265_v37, %v265_v37 }
 0x12d   :  { %v270_v39 = vsel %vm269_vm0, %v268_v38, 0.0 }
 0x12e   :  { %271 = vadd.xlane.f32.xlu0 %v270_v39 }
 0x130   :  { %v266_v40 = vpop.f32.mrf.mxu2 }
 0x1a1   :  { %v272_v41 = vpop.xlane.xlu0 %271 }
 0x1a2   :  { %v273_v42 = vmax.f32 %v272_v41, 1e-24 }
 0x1a4   :  { %425 = vrsqrt.f32 %v273_v42  ;;  %vm280_vm2 = vweird.f32 %v273_v42 }
 0x1aa   :  { %v426_v43 = vpop.eup %425 }
 0x1ab   :  { %v275_v44 = vmul.f32 %v426_v43, %v273_v42  ;;  %vm281_vm1 = vweird.f32 %v426_v43 }
 0x1ac   :  { %vm282_vm3 = vmor %vm280_vm2, %vm281_vm1 }
 0x1ad   :  { %v276_v45 = vmul.f32 %v426_v43, %v275_v44 }
 0x1af   :  { %v277_v46 = vmul.f32 0.5, %v276_v45 }
 0x1b1   :  { %v278_v47 = vsub.f32 1.5, %v277_v46 }
 0x1b3   :  { %v279_v48 = vmul.f32 %v426_v43, %v278_v47 }
 0x1b5   :  { %v283_v49 = vsel %vm282_vm3, %v426_v43, %v279_v48 }
 0x1b6   :  { %v284_v50 = vmul.f32 %v283_v49, %v265_v37 }
 0x1b8   :  { %285 = vst [vmem:[#allocation2] sm:$0x3] %v284_v50 }
 0x1b9   :  { %296 = dma.vmem_to_hbm [thread:$0]  %s292_s3, 32, %s294_s20, [#allocation3]  }
 0x1ba   :  { %451 = dma.done.wait [#allocation3], 32  }
 0x1bb   :  { %452 = vsyncadd [#allocation3], 4294967264 }
 0x1bc   :  { %301 = vsyncpa [#allocation3], 1 }

// kernel: mclip_forward.2
= control target key start
LH: loop header
LB: loop body
LE: loop exit
PB: predicated region body
PF: predicated region fallthrough
CT: control target
= control target key end

     0   :  { %vm87_vm0 = vcmask 123904   ;;  %v36_v1 = vlaneseq  ;;  %s391_s0 = inlined_call_operand.vmem [shape: bf16[2,16,128], index: 0, kind: input, shape index: {}]   ;;  %s392_s1 = inlined_call_operand.vmem [shape: f32[2,16], index: 1, kind: input, shape index: {}]   ;;  %s393_s2 = inlined_call_operand.vmem [shape: bf16[128,128], index: 2, kind: input, shape index: {}]   ;;  %s394_s3 = inlined_call_operand.vmem [shape: f32[1,128], index: 3, kind: input, shape index: {}]   ;;  %s395_s4 = inlined_call_operand.hbm [shape: f32[2,128], index: 4, kind: output, shape index: {}]  }
   0x1   :  { %v33_v0 = vld [vmem:[%s392_s1] sm:$0x3] }
   0x2   :  { %v88_v2 = vsel %vm87_vm0, %v33_v0, 0.0 }
   0x3   :  { %9 = vsyncpa [#allocation5], 0  ;;  %89 = vadd.xlane.f32.xlu0 %v88_v2  ;;  %v37_v3 = vshrl.u32 %v36_v1, 7  ;;  %v35_v5 = vperm.slane %v33_v0, 0  ;;  %v48_v6 = vperm.slane %v33_v0, 1  ;;  %vm23_vm1 = vcmask 1024  }
   0x4   :  { %v324_v7 = vmov 0.0   ;;  %v325_v8 = vmov 0   ;;  %v276_v13 = vld [vmem:[%s391_s0] sm:$0xff]   ;;  %v274_v15 = vld [vmem:[%s393_s2 + $0x38] sm:$0xff]  ;;  %v273_v18 = vld [vmem:[%s393_s2 + $0x30] sm:$0xff]  ;;  %vm81_vm2 = vcmask 1041409  }
   0x5   :  { %v44_v4 = vadd.s32 8, %v37_v3  ;;  %287 = vset.pattern.permute.xlu0 %v37_v3  ;;  %22 = vst [vmem:[#allocation2] sm:$0x3] %v324_v7  ;;  %v278_v14 = vunpack.c.h.bf16 %v276_v13  ;;  %v277_v16 = vunpack.c.l.bf16 %v276_v13  ;;  %188 = vmatpush.bf16.msra.mxu0 %v274_v15  ;;  %v283_v20 = vld [vmem:[%s391_s0 + $0x8] sm:$0xff]   ;;  %v271_v47 = vld [vmem:[%s393_s2 + $0x20] sm:$0xff]  ;;  %v270_v48 = vld [vmem:[%s393_s2 + $0x18] sm:$0xff] }
   0x6   :  { %24 = vst.msk [vmem:[#allocation3] sm:$0x3] %vm23_vm1, %v324_v7  ;;  %v272_v23 = vld [vmem:[%s393_s2 + $0x28] sm:$0xff]  ;;  %v282_v24 = vunpack.c.h.bf16 %v283_v20  ;;  %v281_v27 = vunpack.c.l.bf16 %v283_v20  ;;  %v269_v49 = vld [vmem:[%s393_s2 + $0x10] sm:$0xff]  ;;  %v267_v51 = vld [vmem:[%s393_s2] sm:$0xff]  ;;  %vm202_vm7 = vcmask 1041408  }
   0x7   :  { %288 = vset.pattern.permute.xlu1 %v44_v4  ;;  %290 = vset.pattern.permute.xlu2 %v44_v4  ;;  %v268_v50 = vld [vmem:[%s393_s2 + $0x8] sm:$0xff]  ;;  %v293_v2 = vld [vmem:[%s394_s3] ss:$0 sm:$0xff]  ;;  %s326_s10 = smov [#allocation4]   ;;  %s226_s13 = sshll.u32 %s395_s4, 4  ;;  %s227_s13 = int_to_ptr.hbm [resolvable:$true] %s226_s13 }
   0x8   :  { %s224_s3 = sshll.u32 %s326_s10, 4  ;;  %s225_s3 = int_to_ptr.vmem [resolvable:$true] %s224_s3 }
   0x9   :  { %189 = vmatpush.bf16.msra.mxu0 %v273_v18 }
   0xc   :  { %v34_v44 = vld [vmem:[#allocation2] sm:$0x3] }
   0xd   :  { %v86_v9 = vld [vmem:[#allocation3] sm:$0x3]  ;;  %190 = vmatpush.bf16.msra.mxu0 %v272_v23 }
   0xf   :  { %46 = vperm.xlu1 %288, %v35_v5   ;;  %59 = vperm.xlu2 %290, %v48_v6  }
  0x11   :  { %191 = vmatpush.bf16.msra.mxu0 %v271_v47 }
  0x15   :  { %192 = vmatpush.bf16.msra.mxu0 %v270_v48 }
  0x17   :  { %289 = vset.pattern.permute.xlu1 %v37_v3  ;;  %40 = vperm.xlu0 %287, %v35_v5  }
  0x18   :  { %291 = vset.pattern.permute.xlu2 %v325_v8 }
  0x19   :  { %193 = vmatpush.bf16.msra.mxu0 %v269_v49 }
  0x1d   :  { %194 = vmatpush.bf16.msra.mxu0 %v268_v50 }
  0x1f   :  { %53 = vperm.xlu1 %289, %v48_v6   ;;  %292 = vset.pattern.permute.xlu0 %v325_v8 }
  0x21   :  { %195 = vmatpush.bf16.msra.mxu0 %v267_v51 }
  0x69   :  { %v60_v26 = vpop.permute.xlu2 %59 }
  0x6a   :  { %v64_v29 = vmul.f32 %v282_v24, %v60_v26 }
  0x76   :  { %v90_v10 = vpop.xlane.xlu0 %89 }
  0x77   :  { %v91_v11 = vadd.f32 %v90_v10, %v86_v9 }
  0x79   :  { %93 = vst.msk [vmem:[#allocation3] sm:$0x3] %vm23_vm1, %v91_v11 }
  0x80   :  { %v98_v12 = vld [vmem:[#allocation3] sm:$0x3] }
  0x81   :  { %101 = vperm.xlu2 %291, %v98_v12   ;;  %v47_v17 = vpop.permute.xlu1 %46 }
  0x82   :  { %v62_v19 = vmul.f32 %v278_v14, %v47_v17 }
  0x89   :  { %v41_v21 = vpop.permute.xlu0 %40 }
  0x8a   :  { %v61_v22 = vmul.f32 %v277_v16, %v41_v21 }
  0x8c   :  { %v65_v25 = vadd.f32 %v62_v19, %v61_v22 }
  0x8e   :  { %v66_v28 = vrot.slane %v65_v25, 4 }
  0x90   :  { %v67_v30 = vadd.f32 %v66_v28, %v65_v25 }
  0x91   :  { %v54_v31 = vpop.permute.xlu1 %53 }
  0x92   :  { %v63_v32 = vmul.f32 %v281_v27, %v54_v31  ;;  %v68_v33 = vrot.slane %v67_v30, 2 }
  0x94   :  { %v72_v34 = vadd.f32 %v64_v29, %v63_v32  ;;  %v69_v36 = vadd.f32 %v68_v33, %v67_v30 }
  0x96   :  { %v73_v35 = vrot.slane %v72_v34, 4  ;;  %v70_v39 = vrot.slane %v69_v36, 1 }
  0x98   :  { %v74_v37 = vadd.f32 %v73_v35, %v72_v34  ;;  %v71_v42 = vadd.f32 %v70_v39, %v69_v36 }
  0x9a   :  { %v75_v38 = vrot.slane %v74_v37, 2 }
  0x9c   :  { %v76_v40 = vadd.f32 %v75_v38, %v74_v37 }
  0x9e   :  { %v77_v41 = vrot.slane %v76_v40, 1 }
  0xa0   :  { %v78_v43 = vadd.f32 %v77_v41, %v76_v40 }
  0xa2   :  { %v82_v45 = vsel %vm81_vm2, %v78_v43, %v71_v42 }
  0xa3   :  { %v84_v46 = vadd.f32 %v82_v45, %v34_v44 }
  0xa5   :  { %85 = vst [vmem:[#allocation2] sm:$0x3] %v84_v46 }
  0xac   :  { %v97_v62 = vld [vmem:[#allocation2] sm:$0x3] }
  0xdb   :  { %v102_v52 = vpop.permute.xlu2 %101 }
  0xdc   :  { %294 = vrcp.f32 %v102_v52  ;;  %v115_v56 = vand.u32 2147483648, %v102_v52  ;;  %v113_v58 = vand.u32 2147483647, %v102_v52  ;;  %vm109_vm4 = vweird.f32 %v102_v52 }
  0xde   :  { %v116_v60 = vor.u32 1.1754944e-38, %v115_v56  ;;  %vm114_vm6 = vcmp.eq.f32.partialorder %v113_v58, 8.507059e+37 }
  0xe2   :  { %v295_v53 = vpop.eup %294 }
  0xe3   :  { %v105_v54 = vmul.f32 %v295_v53, %v102_v52  ;;  %vm110_vm3 = vweird.f32 %v295_v53 }
  0xe4   :  { %vm111_vm5 = vmor %vm109_vm4, %vm110_vm3 }
  0xe5   :  { %v106_v55 = vsub.f32 1.0, %v105_v54 }
  0xe7   :  { %v107_v57 = vmul.f32 %v295_v53, %v106_v55 }
  0xe9   :  { %v108_v59 = vadd.f32 %v295_v53, %v107_v57 }
  0xeb   :  { %v112_v61 = vsel %vm111_vm5, %v295_v53, %v108_v59 }
  0xec   :  { %v117_v63 = vsel %vm114_vm6, %v116_v60, %v112_v61 }
  0xed   :  { %v118_v0 = vmul.f32 %v117_v63, %v97_v62 }
  0xef   :  { %v119_v1 = vpack.c.bf16 %v118_v0, %v118_v0 }
  0xf1   :  { %196 = vmatmul.bf16.vlgmr.msra.gmra.mxu0 %v119_v1 }
 0x16e   :  { %v197_v3 = vpop.f32.mrf.mxu0 }
 0x16f   :  { %v198_v4 = vadd.f32 %v293_v2, %v197_v3 }
 0x171   :  { %v201_v5 = vmul.f32 %v198_v4, %v198_v4 }
 0x173   :  { %v203_v6 = vsel %vm202_vm7, %v201_v5, 0.0 }
 0x174   :  { %204 = vadd.xlane.f32.xlu1 %v203_v6 }
 0x176   :  { %v199_v7 = vpop.f32.mrf.mxu0 }
 0x1e7   :  { %v205_v8 = vpop.xlane.xlu1 %204 }
 0x1e8   :  { %v206_v9 = vmax.f32 %v205_v8, 1e-24 }
 0x1ea   :  { %296 = vrsqrt.f32 %v206_v9  ;;  %vm213_vm9 = vweird.f32 %v206_v9 }
 0x1f0   :  { %v297_v10 = vpop.eup %296 }
 0x1f1   :  { %v208_v11 = vmul.f32 %v297_v10, %v206_v9  ;;  %vm214_vm8 = vweird.f32 %v297_v10 }
 0x1f2   :  { %vm215_vm10 = vmor %vm213_vm9, %vm214_vm8 }
 0x1f3   :  { %v209_v12 = vmul.f32 %v297_v10, %v208_v11 }
 0x1f5   :  { %v210_v13 = vmul.f32 0.5, %v209_v12 }
 0x1f7   :  { %v211_v14 = vsub.f32 1.5, %v210_v13 }
 0x1f9   :  { %v212_v15 = vmul.f32 %v297_v10, %v211_v14 }
 0x1fb   :  { %v216_v16 = vsel %vm215_vm10, %v297_v10, %v212_v15 }
 0x1fc   :  { %v217_v17 = vmul.f32 %v216_v16, %v198_v4 }
 0x1fe   :  { %218 = vst [vmem:[#allocation4] sm:$0x3] %v217_v17 }
 0x1ff   :  { %229 = dma.vmem_to_hbm [thread:$0]  %s225_s3, 32, %s227_s13, [#allocation5]  }
 0x200   :  { %322 = dma.done.wait [#allocation5], 32  }
 0x201   :  { %323 = vsyncadd [#allocation5], 4294967264 }
 0x202   :  { %234 = vsyncpa [#allocation5], 1 }

</bundles_post_ra>
